<compile_context>
chip_gen: v6e
topology: v6e:2x2x1
jax: 0.10.0
libtpu: 0.0.40
codegen_flags: <defaults>
</compile_context>

<pallas_src>
import jax
import jax.numpy as jnp
from jax import lax
from jax.experimental import pallas as pl
from jax.experimental.pallas import tpu as pltpu


_CHUNK = 512  # lanes processed per inner-loop step (bounds vreg live ranges)


def _from_rgb_kernel(x_ref, w_ref, b_ref, o_ref):
    # x_ref: (1, Cin, T)      spatial pixels on the lane axis
    # w_ref: (Cin, Cout, 1)   equalized-LR scale already folded in
    # b_ref: (Cout, 1)
    # o_ref: (1, Cout, T)
    cin = x_ref.shape[1]
    t = x_ref.shape[2]

    # tiny parameters: load once, hoisted out of the chunk loop
    w = w_ref[...].astype(jnp.float32)          # (Cin, Cout, 1)
    b = b_ref[...].astype(jnp.float32)          # (Cout, 1)

    def compute_chunk(x_chunk):                 # x_chunk: (Cin, C) f32
        acc = w[0] * x_chunk[0:1, :]            # (Cout, C) broadcast FMA on VPU
        for c in range(1, cin):                 # static unroll; Cin=3 for RGB
            acc = acc + w[c] * x_chunk[c:c + 1, :]
        y = acc + b
        return jnp.maximum(y, jnp.float32(0.2) * y)   # LeakyReLU(0.2)

    n_full = t // _CHUNK
    rem = t % _CHUNK

    if n_full > 0:
        def body(i, carry):
            start = pl.multiple_of(i * _CHUNK, 128)
            x_c = x_ref[0, :, pl.ds(start, _CHUNK)].astype(jnp.float32)
            o_ref[0, :, pl.ds(start, _CHUNK)] = compute_chunk(x_c).astype(o_ref.dtype)
            return carry
        lax.fori_loop(0, n_full, body, 0)

    if rem > 0:
        start = n_full * _CHUNK                 # static tail (rare; T is usually
        x_c = x_ref[0, :, start:start + rem].astype(jnp.float32)  # a CHUNK multiple)
        o_ref[0, :, start:start + rem] = compute_chunk(x_c).astype(o_ref.dtype)


def _choose_tile(hw, n, cin, cout, in_itemsize, out_itemsize,
                 vmem_budget_bytes):
    """Pick spatial tile T and number of spatial tiles, avoiding padding."""
    # double-buffered input + output bytes per spatial lane
    per_lane = 2 * (cin * in_itemsize + cout * out_itemsize)
    t_budget = max(128, (vmem_budget_bytes // per_lane) // 128 * 128)

    if hw <= t_budget:
        t, n_spatial = hw, 1          # block == full dim: no 128-multiple needed
    else:
        # largest 128-multiple divisor of HW within the budget (ProGAN: HW is a
        # power of two, so this always succeeds for HW >= 128)
        t = 0
        cand = min(t_budget, (hw // 128) * 128)
        while cand >= 128:
            if hw % cand == 0:
                t = cand
                break
            cand -= 128
        if t == 0:
            return None               # no clean divisor -> caller pads (fallback)
        n_spatial = hw // t

    # v7x has 2 TensorCores: make sure a "parallel" axis has >= 2 steps if we can.
    if n * n_spatial == 1 and hw >= 256 and hw % 256 == 0:
        t = hw // 2
        n_spatial = 2
    return t, n_spatial


def from_rgb(x_nchw, weight, bias, *, vmem_budget_bytes=32 * 1024 * 1024):
    """x_nchw: (N, Cin, H, W); weight: (Cout, Cin, 1, 1); bias: (Cout,)."""
    N, Cin, H, W = x_nchw.shape
    Cout = weight.shape[0]
    scale = float((2.0 / (Cin * 1 * 1)) ** 0.5)

    HW = H * W
    x_r = x_nchw.reshape(N, Cin, HW)             # pure reshape, no transpose

    in_isz = jnp.dtype(x_nchw.dtype).itemsize
    out_isz = in_isz                             # output keeps the input dtype

    choice = _choose_tile(HW, N, Cin, Cout, in_isz, out_isz, vmem_budget_bytes)
    if choice is not None:
        T, n_spatial = choice
        HW_pad = HW
    else:
        # fallback for HW with no 128-multiple divisor: pad (extra HBM pass)
        per_lane = 2 * (Cin * in_isz + Cout * out_isz)
        T = max(128, (vmem_budget_bytes // per_lane) // 128 * 128)
        HW_pad = ((HW + T - 1) // T) * T
        x_r = jnp.pad(x_r, ((0, 0), (0, 0), (0, HW_pad - HW)))
        n_spatial = HW_pad // T

    # fold equalized-LR scale into the tiny weight; lay out as (Cin, Cout, 1)
    # so the kernel reads each channel's column as a (Cout, 1) tile.
    w_cols = (weight.reshape(Cout, Cin).astype(jnp.float32) * scale).T
    w_cols = w_cols.reshape(Cin, Cout, 1)
    b_col = bias.reshape(Cout, 1).astype(jnp.float32)

    # VMEM limit: enough for the double-buffered tiles plus headroom, but
    # capped so it always fits v7x's 64 MiB physical VMEM.
    working = 2 * (Cin * in_isz + Cout * out_isz) * T + 64 * 1024
    vmem_limit = int(min(48 * 1024 * 1024, max(16 * 1024 * 1024, 2 * working)))

    out = pl.pallas_call(
        _from_rgb_kernel,
        out_shape=jax.ShapeDtypeStruct((N, Cout, HW_pad), x_nchw.dtype),
        grid_spec=pltpu.PrefetchScalarGridSpec(
            num_scalar_prefetch=0,
            grid=(N, n_spatial),
            in_specs=[
                pl.BlockSpec((1, Cin, T), lambda n, s: (n, 0, s)),
                pl.BlockSpec((Cin, Cout, 1), lambda n, s: (0, 0, 0)),
                pl.BlockSpec((Cout, 1), lambda n, s: (0, 0)),
            ],
            out_specs=pl.BlockSpec((1, Cout, T), lambda n, s: (n, 0, s)),
        ),
        compiler_params=pltpu.CompilerParams(
            dimension_semantics=("parallel", "parallel"),
            vmem_limit_bytes=vmem_limit,
        ),
    )(x_r, w_cols, b_col)

    if HW_pad != HW:
        out = out[:, :, :HW]
    return out.reshape(N, Cout, H, W)


def _reference(x_nchw, weight, bias):
    N, Cin, H, W = x_nchw.shape
    Cout = weight.shape[0]
    scale = (2.0 / Cin) ** 0.5
    y = jnp.einsum('oc,nchw->nohw', weight.reshape(Cout, Cin),
                   x_nchw.astype(jnp.float32) * scale)
    y = y + bias[None, :, None, None]
    y = jnp.where(y >= 0, y, 0.2 * y)
    return y.astype(x_nchw.dtype)


if __name__ == "__main__":
    key = jax.random.PRNGKey(0)
    kx, kw, kb = jax.random.split(key, 3)

    N, Cin, H, W = 2, 3, 16, 16          # RGB input, small spatial
    Cout = 32

    x = jax.random.normal(kx, (N, Cin, H, W), dtype=jnp.float32)
    weight = jax.random.normal(kw, (Cout, Cin, 1, 1), dtype=jnp.float32)
    # bias is zero-init in WSConv2d; use a nonzero one to exercise the add path
    bias = 0.1 * jax.random.normal(kb, (Cout,), dtype=jnp.float32)

    out = jax.block_until_ready(from_rgb(x, weight, bias))

    ref = _reference(x, weight, bias)
    assert out.shape == (N, Cout, H, W)
    assert jnp.allclose(out, ref, atol=1e-5, rtol=1e-5)

    print("KERNEL_OK")
</pallas_src>

<mosaic_0001>
module attributes {stable_mosaic.version = 11 : i64} {
  func.func @_from_rgb_kernel(%arg0: i32, %arg1: i32, %arg2: memref<1x3x256xf32, #tpu.memory_space<vmem>>, %arg3: memref<3x32x1xf32, #tpu.memory_space<vmem>>, %arg4: memref<32x1xf32, #tpu.memory_space<vmem>>, %arg5: memref<1x32x256xf32, #tpu.memory_space<vmem>>) attributes {dimension_semantics = [#tpu.dimension_semantics<parallel>, #tpu.dimension_semantics<parallel>], iteration_bounds = array<i64: 2, 1>, scalar_prefetch = 0 : i64, scratch_operands = 0 : i64, tpu.core_type = #tpu.core_type<tc>, window_params = [{transform_indices = @transform_0, window_bounds = array<i64: 1, 3, 256>}, {pipeline_mode = #tpu.pipeline_mode<synchronous>, transform_indices = @transform_1, window_bounds = array<i64: 3, 32, 1>}, {pipeline_mode = #tpu.pipeline_mode<synchronous>, transform_indices = @transform_2, window_bounds = array<i64: 32, 1>}, {transform_indices = @transform_3, window_bounds = array<i64: 1, 32, 256>}]} {
    %c0 = arith.constant 0 : index
    %c0_0 = arith.constant 0 : index
    %c0_1 = arith.constant 0 : index
    %0 = vector.load %arg3[%c0, %c0_0, %c0_1] : memref<3x32x1xf32, #tpu.memory_space<vmem>>, vector<3x32x1xf32>
    %c0_2 = arith.constant 0 : index
    %c0_3 = arith.constant 0 : index
    %1 = vector.load %arg4[%c0_2, %c0_3] : memref<32x1xf32, #tpu.memory_space<vmem>>, vector<32x1xf32>
    %c0_4 = arith.constant 0 : index
    %c0_5 = arith.constant 0 : index
    %c0_6 = arith.constant 0 : index
    %2 = vector.load %arg2[%c0_4, %c0_5, %c0_6] : memref<1x3x256xf32, #tpu.memory_space<vmem>>, vector<1x3x256xf32>
    %3 = vector.shape_cast %2 : vector<1x3x256xf32> to vector<3x256xf32>
    %4 = vector.extract_strided_slice %0 {offsets = [0, 0, 0], sizes = [1, 32, 1], strides = [1, 1, 1]} : vector<3x32x1xf32> to vector<1x32x1xf32>
    %5 = vector.shape_cast %4 : vector<1x32x1xf32> to vector<32x1xf32>
    %6 = vector.extract_strided_slice %3 {offsets = [0, 0], sizes = [1, 256], strides = [1, 1]} : vector<3x256xf32> to vector<1x256xf32>
    %7 = vector.broadcast %5 : vector<32x1xf32> to vector<32x256xf32>
    %8 = vector.broadcast %6 : vector<1x256xf32> to vector<32x256xf32>
    %9 = arith.mulf %7, %8 : vector<32x256xf32>
    %10 = vector.extract_strided_slice %0 {offsets = [1, 0, 0], sizes = [1, 32, 1], strides = [1, 1, 1]} : vector<3x32x1xf32> to vector<1x32x1xf32>
    %11 = vector.shape_cast %10 : vector<1x32x1xf32> to vector<32x1xf32>
    %12 = vector.extract_strided_slice %3 {offsets = [1, 0], sizes = [1, 256], strides = [1, 1]} : vector<3x256xf32> to vector<1x256xf32>
    %13 = vector.broadcast %11 : vector<32x1xf32> to vector<32x256xf32>
    %14 = vector.broadcast %12 : vector<1x256xf32> to vector<32x256xf32>
    %15 = arith.mulf %13, %14 : vector<32x256xf32>
    %16 = arith.addf %9, %15 : vector<32x256xf32>
    %17 = vector.extract_strided_slice %0 {offsets = [2, 0, 0], sizes = [1, 32, 1], strides = [1, 1, 1]} : vector<3x32x1xf32> to vector<1x32x1xf32>
    %18 = vector.shape_cast %17 : vector<1x32x1xf32> to vector<32x1xf32>
    %19 = vector.extract_strided_slice %3 {offsets = [2, 0], sizes = [1, 256], strides = [1, 1]} : vector<3x256xf32> to vector<1x256xf32>
    %20 = vector.broadcast %18 : vector<32x1xf32> to vector<32x256xf32>
    %21 = vector.broadcast %19 : vector<1x256xf32> to vector<32x256xf32>
    %22 = arith.mulf %20, %21 : vector<32x256xf32>
    %23 = arith.addf %16, %22 : vector<32x256xf32>
    %24 = vector.broadcast %1 : vector<32x1xf32> to vector<32x256xf32>
    %25 = arith.addf %23, %24 : vector<32x256xf32>
    %cst = arith.constant 2.000000e-01 : f32
    %26 = vector.broadcast %cst : f32 to vector<32x256xf32>
    %27 = arith.mulf %26, %25 : vector<32x256xf32>
    %28 = arith.maximumf %25, %27 : vector<32x256xf32>
    %c0_7 = arith.constant 0 : index
    %c0_8 = arith.constant 0 : index
    %c0_9 = arith.constant 0 : index
    %29 = vector.load %arg5[%c0_7, %c0_8, %c0_9] : memref<1x32x256xf32, #tpu.memory_space<vmem>>, vector<1x32x256xf32>
    %30 = vector.shape_cast %29 : vector<1x32x256xf32> to vector<32x256xf32>
    %31 = vector.shape_cast %28 : vector<32x256xf32> to vector<1x32x256xf32>
    tpu.vector_store %arg5[%c0_7, %c0_8, %c0_9], %31 {strides = array<i32>} : memref<1x32x256xf32, #tpu.memory_space<vmem>>, vector<1x32x256xf32>,
    return
  }
  func.func @transform_0(%arg0: i32, %arg1: i32) -> (i32, i32, i32) {
    %c0_i32 = arith.constant 0 : i32
    %c0_i32_0 = arith.constant 0 : i32
    return %arg0, %c0_i32, %arg1 : i32, i32, i32
  }
  func.func @transform_1(%arg0: i32, %arg1: i32) -> (i32, i32, i32) {
    %c0_i32 = arith.constant 0 : i32
    %c0_i32_0 = arith.constant 0 : i32
    %c0_i32_1 = arith.constant 0 : i32
    %c0_i32_2 = arith.constant 0 : i32
    return %c0_i32, %c0_i32_0, %c0_i32_1 : i32, i32, i32
  }
  func.func @transform_2(%arg0: i32, %arg1: i32) -> (i32, i32) {
    %c0_i32 = arith.constant 0 : i32
    %c0_i32_0 = arith.constant 0 : i32
    %c0_i32_1 = arith.constant 0 : i32
    return %c0_i32, %c0_i32_0 : i32, i32
  }
  func.func @transform_3(%arg0: i32, %arg1: i32) -> (i32, i32, i32) {
    %c0_i32 = arith.constant 0 : i32
    %c0_i32_0 = arith.constant 0 : i32
    return %arg0, %c0_i32, %arg1 : i32, i32, i32
  }
}

</mosaic_0001>

<bundles_post_ra>
// kernel: tpu_custom_call.1
= control target key start
LH: loop header
LB: loop body
LE: loop exit
PB: predicated region body
PF: predicated region fallthrough
CT: control target
= control target key end

     0   :  { %8 = vsyncpa [#allocation3], 0  ;;  %s862_s0 = inlined_call_operand.vmem [shape: f32[2,3,256], index: 0, kind: input, shape index: {}]   ;;  %s863_s1 = inlined_call_operand.vmem [shape: f32[3,32,1], index: 1, kind: input, shape index: {}]   ;;  %s864_s2 = inlined_call_operand.vmem [shape: f32[32,1], index: 2, kind: input, shape index: {}]   ;;  %s865_s3 = inlined_call_operand.hbm [shape: f32[2,32,256], index: 3, kind: output, shape index: {}]  }
   0x1   :  { %10 = vsyncpa [#allocation3 + $0x1], 0  ;;  %s696_s12 = smov 0   ;;  %s698_s13 = smov 0  }
   0x2   :  { %s700_s14 = smov 0   ;;  %s702_s15 = smov 0  }
   0x3   :  { %s704_s16 = smov 0   ;;  %s706_s17 = smov 0  }
   0x4 LB: > { %s519_s18 = sadd.s32 4294967295, %s670_s17   ;;  %s520_s19 = sadd.s32 4294967294, %s670_s17   ;;  %s670_s17 = sphi %s706_s17, %s16_s17   ;;  %s666_s16 = sphi %s704_s16, %s872_s16   ;;  %s662_s15 = sphi %s702_s15, %s871_s15   ;;  %s658_s14 = sphi %s700_s14, %s870_s14   ;;  %s654_s13 = sphi %s698_s13, %s869_s13   ;;  %s650_s12 = sphi %s696_s12, %s868_s12  }
   0x5   : > { %s28_s20 = sadd.s32 1, %s666_s16  ;;  %s107_s21 = sadd.s32 1, %s658_s14 }
   0x6   : > { %p30_p0 = scmp.ge.s32.totalorder %s28_s20, 2  ;;  %p117_p1 = scmp.ne.s32.totalorder %s658_s14, %s654_s13 }
   0x7   : > { %p118_p2 = scmp.eq.s32.totalorder %s519_s18, 1  ;;  %p123_p3 = scmp.ne.s32.totalorder %s654_s13, %s650_s12 }
   0x8   : > { %s874_s20 = smov (%p30_p0, %s28_s20), 0  ;;  %p124_p5 = scmp.eq.s32.totalorder %s520_s19, 1 }
   0x9   : > { %p736_p4 = por %p118_p2, %p117_p1  ;;  %s102_s23 = ssub.s32 %s666_s16, %s874_s20 }
   0xa   : > { %p523_p6 = scmp.ge.s32.totalorder %s670_s17, 1  ;;  %p105_p7 = scmp.eq.s32.totalorder %s102_s23, 0 }
   0xb   : > { %p743_p8 = por %p124_p5, %p123_p3  ;;  %p161_p9 = scmp.lt.s32.totalorder %s670_s17, 3 }
   0xc   : > { %s749_s25 = scalar_select %p105_p7, %s658_s14, %s107_s21  }
   0xd   : > { %p162_p10 = pnand %p523_p6, %p161_p9 }
   0xe   : > { %p190_p11 = scmp.lt.s32.totalorder (!%p162_p10), %s662_s15, 1  ;;  %s186_s29 = sand.u32 (!%p162_p10), 1, %s654_s13  }
   0xf   : > { %165 = sbr.rel (%p162_p10) target bundleno = 196 (0xc4), region = 32  ;;  %s524_s30 = sshll.u32 (!%p162_p10), %s186_s29, 6 }
  0x10   : > { %s533_s4 = sshll.u32 (!%p162_p10), %s662_s15, 10  ;;  %s188_s5 = scalar_lea.vmem (!%p162_p10), [#allocation2], %s524_s30 }
  0x11   : > { %s440_s6 = sshll.u32 (!%p162_p10), %s188_s5, 4  ;;  %s811_s9 = scalar_lea.hbm (!%p162_p10), %s865_s3, %s533_s4  ;;  %s813_s6 = int_to_ptr.vmem [resolvable:$true] %s440_s6 }
  0x12   : > { %s594_s10 = scalar_lea.vmem (!%p162_p10), %s813_s6, 1024  ;;  %s673_s11 = smov (!%p162_p10), [#allocation2]  }
  0x13   : > { %p595_p12 = scmp.ne.s32.totalorder (!%p162_p10), %s813_s6, %s594_s10  ;;  %s598_s18 = sshll.u32 (!%p162_p10), %s673_s11, 4  ;;  %s599_s18 = int_to_ptr.vmem [resolvable:$false] %s598_s18 }
  0x14   : > { %v202_v0 = vld [vmem:[%s863_s1 + $0x10] sm:$0xff]  ;;  %v200_v1 = vld [vmem:[%s863_s1] sm:$0xff]  ;;  %v672_v2 = vmov 0   ;;  %v203_v3 = vld [vmem:[%s863_s1 + $0x18] sm:$0xff]  ;;  %s191_s21 = scalar_select %p190_p11, %s662_s15, 1  ;;  %v238_v17 = vlaneseq }
  0x15   : > { %593 = vset.pattern.permute.xlu1 %v672_v2  ;;  %592 = vset.pattern.permute.xlu0 %v672_v2  ;;  %v201_v4 = vld [vmem:[%s863_s1 + $0x8] sm:$0xff]  ;;  %v204_v6 = vld [vmem:[%s863_s1 + $0x20] sm:$0xff]  ;;  %v207_v7 = vld [vmem:[%s863_s1 + $0x38] sm:$0xff]  ;;  %s817_s15 = scalar_lea.sflag [#allocation3], %s186_s29  ;;  %p596_p13 = pnand %p595_p12, %p736_p4 }
  0x16   : > { %229 = vperm.xlu1 %593, %v202_v0   ;;  %219 = vperm.xlu0 %592, %v200_v1   ;;  %v205_v5 = vld [vmem:[%s863_s1 + $0x28] sm:$0xff]  ;;  %v206_v8 = vld [vmem:[%s863_s1 + $0x30] sm:$0xff]  ;;  %v208_v10 = vld [vmem:[%s863_s1 + $0x40] sm:$0xff]  ;;  %s532_s23 = sshll.u32 %s191_s21, 3  ;;  %v239_v20 = vshrl.u32 %v238_v17, 7  ;;  %s600_s19 = scalar_lea.vmem %s599_s18, 2048 }
  0x17   : > { %v209_v9 = vld [vmem:[%s863_s1 + $0x48] sm:$0xff]  ;;  %v211_v11 = vld [vmem:[%s863_s1 + $0x58] sm:$0xff]  ;;  %v210_v12 = vld [vmem:[%s863_s1 + $0x50] sm:$0xff]  ;;  %s197_s28 = scalar_lea.vmem %s862_s0, %s532_s23  ;;  %p597_p0 = pneg %p596_p13 }
  0x18   : > { %v213_v13 = vld [vmem:[%s864_s2 + $0x8] sm:$0xff]  ;;  %v212_v14 = vld [vmem:[%s864_s2] sm:$0xff]  ;;  %v215_v15 = vld [vmem:[%s864_s2 + $0x18] sm:$0xff]  ;;  %v286_v23 = vsub.s32 1, %v239_v20  ;;  %v240_v24 = vsub.s32 0, %v239_v20  ;;  %v290_v25 = vsub.s32 5, %v239_v20  ;;  %p601_p1 = scmp.lt.s32.totalorder %s813_s6, %s599_s18  ;;  %p602_p2 = scmp.lt.s32.totalorder %s600_s19, %s594_s10 }
  0x19   : > { %v214_v16 = vld [vmem:[%s864_s2 + $0x10] sm:$0xff]  ;;  %v244_v26 = vsub.s32 4, %v239_v20  ;;  %v216_v27 = vld [vmem:[%s197_s28] sm:$0x77]  ;;  %v340_v28 = vsub.s32 2, %v239_v20  ;;  %v344_v29 = vsub.s32 6, %v239_v20 }
  0x1a   : > { %234 = vperm.xlu1 %593, %v203_v3   ;;  %224 = vperm.xlu0 %592, %v201_v4   ;;  %v287_v31 = vrot.slane %v216_v27, %v286_v23  ;;  %v241_v33 = vrot.slane %v216_v27, %v240_v24  ;;  %v291_v34 = vrot.slane %v216_v27, %v290_v25  ;;  %p603_p3 = por %p602_p2, %p601_p1 }
  0x1b   : > { %v245_v35 = vrot.slane %v216_v27, %v244_v26  ;;  %v341_v36 = vrot.slane %v216_v27, %v340_v28  ;;  %v345_v37 = vrot.slane %v216_v27, %v344_v29 }
  0x1c   : > { %v297_v38 = vrot.slane %v287_v31, %v286_v23  ;;  %v251_v41 = vrot.slane %v241_v33, %v240_v24  ;;  %v301_v42 = vrot.slane %v291_v34, %v286_v23  ;;  %p604_p5 = pnand %p603_p3, %p597_p0 }
  0x1d   : > { %v255_v43 = vrot.slane %v245_v35, %v240_v24  ;;  %v351_v44 = vrot.slane %v341_v36, %v340_v28  ;;  %v355_v45 = vrot.slane %v345_v37, %v340_v28 }
  0x1e   : > { %271 = vperm.xlu1 %593, %v205_v5   ;;  %266 = vperm.xlu0 %592, %v204_v6  }
  0x22   : > { %281 = vperm.xlu1 %593, %v207_v7   ;;  %276 = vperm.xlu0 %592, %v206_v8  }
  0x26   : > { %325 = vperm.xlu1 %593, %v209_v9   ;;  %320 = vperm.xlu0 %592, %v208_v10  }
  0x2a   : > { %335 = vperm.xlu1 %593, %v211_v11   ;;  %330 = vperm.xlu0 %592, %v210_v12  }
  0x2e   : > { %379 = vperm.xlu1 %593, %v213_v13   ;;  %374 = vperm.xlu0 %592, %v212_v14  }
  0x32   : > { %389 = vperm.xlu1 %593, %v215_v15   ;;  %384 = vperm.xlu0 %592, %v214_v16  }
  0x91   : > { %v230_v18 = vpop.permute.xlu1 %229  ;;  %v220_v19 = vpop.permute.xlu0 %219 }
  0x92   : > { %v260_v49 = vmul.f32 %v251_v41, %v230_v18  ;;  %v256_v53 = vmul.f32 %v251_v41, %v220_v19  ;;  %v257_v54 = vmul.f32 %v255_v43, %v220_v19  ;;  %v261_v61 = vmul.f32 %v255_v43, %v230_v18 }
  0x95   : > { %v235_v21 = vpop.permute.xlu1 %234  ;;  %v225_v22 = vpop.permute.xlu0 %224 }
  0x96   : > { %v258_v55 = vmul.f32 %v251_v41, %v225_v22  ;;  %v259_v57 = vmul.f32 %v255_v43, %v225_v22  ;;  %v262_v62 = vmul.f32 %v251_v41, %v235_v21  ;;  %v263_v3 = vmul.f32 %v255_v43, %v235_v21 }
  0x99   : > { %v272_v30 = vpop.permute.xlu1 %271  ;;  %v267_v32 = vpop.permute.xlu0 %266 }
  0x9a   : > { %v304_v46 = vmul.f32 %v297_v38, %v272_v30  ;;  %v305_v50 = vmul.f32 %v301_v42, %v272_v30  ;;  %v302_v51 = vmul.f32 %v297_v38, %v267_v32  ;;  %v303_v52 = vmul.f32 %v301_v42, %v267_v32 }
  0x9c   : > { %v312_v63 = vadd.f32 %v304_v46, %v258_v55  ;;  %v313_v4 = vadd.f32 %v305_v50, %v259_v57  ;;  %v310_v5 = vadd.f32 %v302_v51, %v256_v53  ;;  %v311_v6 = vadd.f32 %v303_v52, %v257_v54 }
  0x9d   : > { %v282_v39 = vpop.permute.xlu1 %281  ;;  %v277_v40 = vpop.permute.xlu0 %276 }
  0x9e   : > { %v308_v0 = vmul.f32 %v297_v38, %v282_v39  ;;  %v309_v7 = vmul.f32 %v301_v42, %v282_v39  ;;  %v306_v8 = vmul.f32 %v297_v38, %v277_v40  ;;  %v307_v9 = vmul.f32 %v301_v42, %v277_v40 }
  0xa0   : > { %v316_v15 = vadd.f32 %v308_v0, %v262_v62  ;;  %v317_v25 = vadd.f32 %v309_v7, %v263_v3  ;;  %v314_v26 = vadd.f32 %v306_v8, %v260_v49  ;;  %v315_v27 = vadd.f32 %v307_v9, %v261_v61 }
  0xa1   : > { %v326_v47 = vpop.permute.xlu1 %325  ;;  %v321_v48 = vpop.permute.xlu0 %320 }
  0xa2   : > { %v358_v56 = vmul.f32 %v351_v44, %v326_v47  ;;  %v359_v58 = vmul.f32 %v355_v45, %v326_v47  ;;  %v356_v59 = vmul.f32 %v351_v44, %v321_v48  ;;  %v357_v60 = vmul.f32 %v355_v45, %v321_v48 }
  0xa4   : > { %v366_v10 = vadd.f32 %v358_v56, %v312_v63  ;;  %v367_v12 = vadd.f32 %v359_v58, %v313_v4  ;;  %v364_v13 = vadd.f32 %v356_v59, %v310_v5  ;;  %v365_v14 = vadd.f32 %v357_v60, %v311_v6 }
  0xa5   : > { %v336_v1 = vpop.permute.xlu1 %335  ;;  %v331_v2 = vpop.permute.xlu0 %330 }
  0xa6   : > { %v362_v11 = vmul.f32 %v351_v44, %v336_v1  ;;  %v363_v16 = vmul.f32 %v355_v45, %v336_v1  ;;  %v360_v17 = vmul.f32 %v351_v44, %v331_v2  ;;  %v361_v18 = vmul.f32 %v355_v45, %v331_v2 }
  0xa8   : > { %v370_v31 = vadd.f32 %v362_v11, %v316_v15  ;;  %v371_v34 = vadd.f32 %v363_v16, %v317_v25  ;;  %v368_v36 = vadd.f32 %v360_v17, %v314_v26  ;;  %v369_v37 = vadd.f32 %v361_v18, %v315_v27 }
  0xa9   : > { %v380_v19 = vpop.permute.xlu1 %379  ;;  %v375_v20 = vpop.permute.xlu0 %374 }
  0xaa   : > { %v394_v21 = vadd.f32 %v380_v19, %v366_v10  ;;  %v395_v22 = vadd.f32 %v380_v19, %v367_v12  ;;  %v392_v23 = vadd.f32 %v375_v20, %v364_v13  ;;  %v393_v24 = vadd.f32 %v375_v20, %v365_v14 }
  0xac   : > { %v402_v28 = vmul.f32 0.2, %v394_v21  ;;  %v403_v29 = vmul.f32 0.2, %v395_v22  ;;  %v400_v30 = vmul.f32 0.2, %v392_v23 }
  0xad   : > { %v401_v32 = vmul.f32 0.2, %v393_v24  ;;  %v390_v33 = vpop.permute.xlu1 %389  ;;  %v385_v35 = vpop.permute.xlu0 %384 }
  0xae   : > { %v410_v38 = vmax.f32 %v394_v21, %v402_v28  ;;  %v411_v39 = vmax.f32 %v395_v22, %v403_v29  ;;  %v408_v40 = vmax.f32 %v392_v23, %v400_v30  ;;  %v398_v41 = vadd.f32 %v390_v33, %v370_v31 }
  0xaf   : > { %v409_v42 = vmax.f32 %v393_v24, %v401_v32  ;;  %v399_v43 = vadd.f32 %v390_v33, %v371_v34  ;;  %v396_v44 = vadd.f32 %v385_v35, %v368_v36  ;;  %v397_v45 = vadd.f32 %v385_v35, %v369_v37 }
  0xb0   : > { %418 = vst [vmem:[%s188_s5 + $0x10] sm:$0xff] %v410_v38  ;;  %419 = vst [vmem:[%s188_s5 + $0x18] sm:$0xff] %v411_v39  ;;  %v406_v46 = vmul.f32 0.2, %v398_v41 }
  0xb1   : > { %416 = vst [vmem:[%s188_s5] sm:$0xff] %v408_v40  ;;  %417 = vst [vmem:[%s188_s5 + $0x8] sm:$0xff] %v409_v42  ;;  %v407_v47 = vmul.f32 0.2, %v399_v43  ;;  %v404_v48 = vmul.f32 0.2, %v396_v44 }
  0xb2   : > { %v405_v49 = vmul.f32 0.2, %v397_v45  ;;  %v414_v50 = vmax.f32 %v398_v41, %v406_v46 }
  0xb3   : > { %v415_v51 = vmax.f32 %v399_v43, %v407_v47  ;;  %v412_v52 = vmax.f32 %v396_v44, %v404_v48 }
  0xb4   : > { %v413_v53 = vmax.f32 %v397_v45, %v405_v49  ;;  %422 = vst [vmem:[%s188_s5 + $0x30] sm:$0xff] %v414_v50 }
  0xb5   : > { %423 = vst [vmem:[%s188_s5 + $0x38] sm:$0xff] %v415_v51  ;;  %420 = vst [vmem:[%s188_s5 + $0x20] sm:$0xff] %v412_v52 }
  0xb6   : > { %421 = vst [vmem:[%s188_s5 + $0x28] sm:$0xff] %v413_v53 }
  0xb7   : > { %607 = shalt.err (!%p604_p5)
}
  0xb8   : > { %s608_s21 = scalar_lea.hbm %s811_s9, 1024  ;;  %s612_s27 = scalar_lea.hbm %s865_s3, 2048 }
  0xb9   : > { %p609_p6 = scmp.ne.s32.totalorder %s811_s9, %s608_s21  ;;  %p613_p10 = scmp.lt.s32.totalorder %s811_s9, %s865_s3 }
  0xba   : > { %p614_p11 = scmp.lt.s32.totalorder %s612_s27, %s608_s21 }
  0xbb   : > { %p610_p7 = pnand %p609_p6, %p736_p4 }
  0xbc   : > { %p615_p12 = por %p614_p11, %p613_p10 }
  0xbd   : > { %p611_p9 = pneg %p610_p7 }
  0xbf   : > { %p616_p13 = pnand %p615_p12, %p611_p9 }
  0xc1   : > { %619 = shalt.err (!%p616_p13)
}
  0xc2   : > { %s674_s30 = smov 256   ;;  %s675_s4 = smov 16  }
  0xc3   : > { %534 = dma.vmem_to_hbm [thread:$0]  (%p736_p4), %s813_s6, 1024, %s811_s9, %s817_s15, %s674_s30, %s674_s30, %s675_s4  }
  0xc4 PF: > { %p540_p0 = scmp.ge.s32.totalorder %s670_s17, 2  ;;  %s455_s5 = sand.u32 1, %s650_s12  }
  0xc5   : > { %s456_s7 = scalar_lea.sflag [#allocation3], %s455_s5 }
  0xc6   : > { %p537_p1 = pnand %p540_p0, %p743_p8 }
  0xc8   : > { %p538_p2 = pneg %p537_p1 }
  0xca   : > { %645 = dma.done.wait (%p538_p2), %s456_s7, 1024  }
  0xcb   : > { %647 = vsyncadd (%p538_p2), %s456_s7, 4294966272  ;;  %s16_s17 = sadd.s32 1, %s670_s17   ;;  %s868_s12 = smov %s654_s13 }
  0xcc   : > { %p13_p3 = scmp.ge.s32.totalorder %s16_s17, 4   ;;  %s869_s13 = smov %s658_s14 }
  0xcd   : > { %s870_s14 = smov %s749_s25  ;;  %s871_s15 = smov %s666_s16 }
  0xce   : > { %s872_s16 = smov %s874_s20  ;;  %15 = sbr.rel (!%p13_p3) target bundleno = 4 (0x4), region = 67 }
  0xd3   :  { %461 = vsyncpa [#allocation3], 1 }
  0xd4   :  { %463 = vsyncpa [#allocation3 + $0x1], 1 }

</bundles_post_ra>
